<compile_context>
chip_gen: v7x
topology: tpu7x:2x2x1
jax: 0.10.0
libtpu: 0.0.40
codegen_flags: <defaults>
</compile_context>

<pallas_src>
import functools

import jax
import jax.numpy as jnp
from jax.experimental import pallas as pl
from jax.experimental.pallas import tpu as pltpu

_WORKSET_BYTES = 36 * 1024 * 1024   # per-step VMEM working-set target (fits v5e/v6e/v7x)
_KF32 = 5                           # live f32 temporaries per block element (x, roll, masked, acc, slack)


def _tv_partial_kernel(x_ref, halo_ref, hmask_ref, vmask_ref, out_ref, *, halo_rows):
    """One (row_tile, W) block: unmasked rolls + cheap boundary masks/corrections."""
    x = x_ref[...].astype(jnp.float32)                       # (row_tile, W), f32 compute

    hmask = hmask_ref[...]                                    # (1, W): 0.0 at w == 0
    vmask = vmask_ref[...]                                    # (row_tile, 1): 0.0 where h == 0

    # Horizontal neighbour x[r, w-1]: lane roll by 1 (XLU); w == 0 sees zero padding.
    left = pltpu.roll(x, shift=1, axis=1)
    left = jnp.where(hmask != 0.0, left, 0.0)
    acc = jnp.abs(x - left)

    # Vertical neighbour x[r-1, w]: sublane roll by 1 (XLU); rows with h == 0 see zero.
    up = pltpu.roll(x, shift=1, axis=0)
    up = jnp.where(vmask != 0.0, up, 0.0)
    acc = acc + jnp.abs(x - up)

    total = jnp.sum(acc)

    # Seam correction for the block's first row: if it is not an image top row
    # (vmask[0] == 1), its true upper neighbour is the last halo row (the row just
    # above this block in HBM), not the wrapped last block row that `up` used.
    m = vmask[0:1, 0:1]                                        # (1, 1): 1.0 or 0.0
    row0 = x[0:1, :]                                           # (1, W)
    wrong = up[0:1, :]                                         # neighbour actually used by acc
    prev = halo_ref[halo_rows - 1:halo_rows, :].astype(jnp.float32)
    total = total + jnp.sum(m * (jnp.abs(row0 - prev) - jnp.abs(row0 - wrong)))

    out_ref[0, 0] = total


def _choose_row_tile(total_rows, width, itemsize, workset_bytes):
    """Largest row tile that divides total_rows, is a multiple of the sublane
    packing (8 f32 / 16 bf16 / 32 int8) or the full dim, and fits the VMEM budget."""
    sub = max(8, 32 // itemsize)
    budget_elems = max(1, workset_bytes // (2 * itemsize + _KF32 * 4))
    max_rows = max(1, budget_elems // max(width, 1))
    if total_rows <= max_rows:
        return total_rows, sub                 # whole problem in one block (full dim is legal)
    best = 0
    t = sub
    limit = min(total_rows, max_rows)
    while t <= limit:
        if total_rows % t == 0:
            best = t
        t += sub
    if best:
        return best, sub
    if total_rows % sub == 0:
        return sub, sub                        # smallest legal tile (only exceeds budget for huge W)
    # Pathological shape (rows not divisible by the sublane multiple and too big to
    # fit the budget): fall back to a single full block.
    return total_rows, sub


def tv_loss(img, *, workset_bytes=_WORKSET_BYTES):
    """img: (N, C, H, W) array (any float dtype).  Returns the scalar TV loss (f32)."""
    N, C, H, W = img.shape
    total_rows = N * C * H
    x2d = img.reshape(total_rows, W)           # no-copy row-major collapse; native dtype DMA
    itemsize = jnp.dtype(img.dtype).itemsize

    row_tile, sub = _choose_row_tile(total_rows, W, itemsize, workset_bytes)
    num_blocks = total_rows // row_tile
    halo_rows = min(sub, total_rows)           # legal halo block height
    rpb = max(row_tile // halo_rows, 1)        # halo blocks per row tile

    # Tiny precomputed boundary masks (VMEM-resident inside the kernel).
    hmask = (jnp.arange(W) != 0).astype(jnp.float32).reshape(1, W)
    vmask = (jnp.arange(total_rows) % H != 0).astype(jnp.float32).reshape(total_rows, 1)

    # Explicit VMEM budget: double-buffered native input + halo + masks + f32 temps.
    block_elems = row_tile * W
    est = 2 * block_elems * itemsize
    est += 2 * halo_rows * W * itemsize
    est += 2 * (W + row_tile) * 4
    est += _KF32 * block_elems * 4
    vmem_limit = int(min(max(est + (4 << 20), 32 << 20), 48 << 20))

    kernel = functools.partial(_tv_partial_kernel, halo_rows=halo_rows)

    partials = pl.pallas_call(
        kernel,
        out_shape=jax.ShapeDtypeStruct((num_blocks, 1), jnp.float32),
        grid_spec=pltpu.PrefetchScalarGridSpec(
            num_scalar_prefetch=0,
            grid=(num_blocks,),
            in_specs=[
                # Main streamed block.
                pl.BlockSpec((row_tile, W), lambda j: (j, 0)),
                # Halo: the `halo_rows` rows just above this block (clamped at the top;
                # the clamped / top-of-image case is killed by the m == 0 factor).
                pl.BlockSpec((halo_rows, W),
                             lambda j: (jnp.maximum(j * rpb - 1, 0), 0)),
                # w == 0 lane mask (constant index map -> stays resident).
                pl.BlockSpec((1, W), lambda j: (0, 0)),
                # h == 0 row mask, tiled with the row blocks.
                pl.BlockSpec((row_tile, 1), lambda j: (j, 0)),
            ],
            out_specs=pl.BlockSpec((1, 1), lambda j: (j, 0),
                                   memory_space=pltpu.MemorySpace.SMEM),
        ),
        compiler_params=pltpu.CompilerParams(
            dimension_semantics=("parallel",),   # independent blocks -> megacore splittable
            vmem_limit_bytes=vmem_limit,
        ),
    )(x2d, x2d, hmask, vmask)

    return jnp.sum(partials) * (1.0 / float(N * C * H * W))


def _tv_loss_ref(img):
    """Plain-JAX reference mirroring the PyTorch module."""
    x = img.astype(jnp.float32)
    x_left = jnp.pad(x[:, :, :, :-1], ((0, 0), (0, 0), (0, 0), (1, 0)))
    x_up = jnp.pad(x[:, :, :-1, :], ((0, 0), (0, 0), (1, 0), (0, 0)))
    return jnp.mean(jnp.abs(x - x_left)) + jnp.mean(jnp.abs(x - x_up))


if __name__ == "__main__":
    key = jax.random.PRNGKey(0)
    # Conv2d(3, 3, ...) in the module implies C == 3.
    img = jax.random.normal(key, (2, 3, 16, 16), dtype=jnp.float32)

    # f32 path (single block).
    loss = jax.block_until_ready(tv_loss(img))
    ref = jax.block_until_ready(_tv_loss_ref(img))
    assert jnp.allclose(loss, ref, rtol=1e-5, atol=1e-5), (loss, ref)

    # Native bf16 path (bf16 DMA, f32 compute inside the kernel).
    img_bf16 = img.astype(jnp.bfloat16)
    loss_bf16 = jax.block_until_ready(tv_loss(img_bf16))
    ref_bf16 = jax.block_until_ready(_tv_loss_ref(img_bf16))
    assert jnp.allclose(loss_bf16, ref_bf16, rtol=1e-4, atol=1e-4), (loss_bf16, ref_bf16)

    # Multi-block path: shrink the working-set budget so the rows split across
    # several grid steps and the H-seam halo correction is exercised (H=96 is not
    # a multiple of the chosen 72-row tile, so some blocks start mid-image).
    img_big = jax.random.normal(jax.random.PRNGKey(1), (2, 3, 96, 128), dtype=jnp.float32)
    loss_big = jax.block_until_ready(tv_loss(img_big, workset_bytes=256 * 1024))
    ref_big = jax.block_until_ready(_tv_loss_ref(img_big))
    assert jnp.allclose(loss_big, ref_big, rtol=1e-5, atol=1e-5), (loss_big, ref_big)

    print("KERNEL_OK")
</pallas_src>

<mosaic_0001>
module attributes {stable_mosaic.version = 11 : i64} {
  func.func @_tv_partial_kernel(%arg0: i32, %arg1: memref<96x16xf32, #tpu.memory_space<vmem>>, %arg2: memref<8x16xf32, #tpu.memory_space<vmem>>, %arg3: memref<1x16xf32, #tpu.memory_space<vmem>>, %arg4: memref<96x1xf32, #tpu.memory_space<vmem>>, %arg5: memref<1x1xf32, #tpu.memory_space<smem>>) attributes {dimension_semantics = [#tpu.dimension_semantics<parallel>], iteration_bounds = array<i64: 1>, scalar_prefetch = 0 : i64, scratch_operands = 0 : i64, tpu.core_type = #tpu.core_type<tc>, window_params = [{transform_indices = @transform_0, window_bounds = array<i64: 96, 16>}, {transform_indices = @transform_1, window_bounds = array<i64: 8, 16>}, {pipeline_mode = #tpu.pipeline_mode<synchronous>, transform_indices = @transform_2, window_bounds = array<i64: 1, 16>}, {transform_indices = @transform_3, window_bounds = array<i64: 96, 1>}, {transform_indices = @transform_4, window_bounds = array<i64: 1, 1>}]} {
    %c0 = arith.constant 0 : index
    %c0_0 = arith.constant 0 : index
    %0 = vector.load %arg1[%c0, %c0_0] : memref<96x16xf32, #tpu.memory_space<vmem>>, vector<96x16xf32>
    %c0_1 = arith.constant 0 : index
    %c0_2 = arith.constant 0 : index
    %1 = vector.load %arg3[%c0_1, %c0_2] : memref<1x16xf32, #tpu.memory_space<vmem>>, vector<1x16xf32>
    %c0_3 = arith.constant 0 : index
    %c0_4 = arith.constant 0 : index
    %2 = vector.load %arg4[%c0_3, %c0_4] : memref<96x1xf32, #tpu.memory_space<vmem>>, vector<96x1xf32>
    %c1_i32 = arith.constant 1 : i32
    %3 = tpu.dynamic_rotate %0 by %c1_i32 dim 1 : vector<96x16xf32>, i32 -> vector<96x16xf32>
    %cst = arith.constant 0.000000e+00 : f32
    %4 = vector.broadcast %cst : f32 to vector<1x16xf32>
    %5 = arith.cmpf one, %1, %4 : vector<1x16xf32>
    %cst_5 = arith.constant 0.000000e+00 : f32
    %6 = vector.shape_cast %5 : vector<1x16xi1> to vector<1x16xi1>
    %7 = vector.broadcast %6 : vector<1x16xi1> to vector<96x16xi1>
    %8 = vector.broadcast %cst_5 : f32 to vector<96x16xf32>
    %9 = arith.select %7, %3, %8 : vector<96x16xi1>, vector<96x16xf32>
    %10 = arith.subf %0, %9 : vector<96x16xf32>
    %11 = math.absf %10 : vector<96x16xf32>
    %c1_i32_6 = arith.constant 1 : i32
    %12 = tpu.dynamic_rotate %0 by %c1_i32_6 dim 0 : vector<96x16xf32>, i32 -> vector<96x16xf32>
    %cst_7 = arith.constant 0.000000e+00 : f32
    %13 = vector.broadcast %cst_7 : f32 to vector<96x1xf32>
    %14 = arith.cmpf one, %2, %13 : vector<96x1xf32>
    %cst_8 = arith.constant 0.000000e+00 : f32
    %15 = vector.shape_cast %14 : vector<96x1xi1> to vector<96x1xi1>
    %16 = vector.broadcast %15 : vector<96x1xi1> to vector<96x16xi1>
    %17 = vector.broadcast %cst_8 : f32 to vector<96x16xf32>
    %18 = arith.select %16, %12, %17 : vector<96x16xi1>, vector<96x16xf32>
    %19 = arith.subf %0, %18 : vector<96x16xf32>
    %20 = math.absf %19 : vector<96x16xf32>
    %21 = arith.addf %11, %20 : vector<96x16xf32>
    %22 = vector.shape_cast %21 : vector<96x16xf32> to vector<1x96x16xf32>
    %cst_9 = arith.constant dense<0.000000e+00> : vector<1xf32>
    %23 = vector.multi_reduction <add>, %22, %cst_9 [1, 2] : vector<1x96x16xf32> to vector<1xf32>
    %24 = vector.shape_cast %23 : vector<1xf32> to vector<1x1x1xf32>
    %25 = vector.extract %24[0, 0, 0] : f32 from vector<1x1x1xf32>
    %26 = vector.extract_strided_slice %2 {offsets = [0, 0], sizes = [1, 1], strides = [1, 1]} : vector<96x1xf32> to vector<1x1xf32>
    %27 = vector.extract_strided_slice %0 {offsets = [0, 0], sizes = [1, 16], strides = [1, 1]} : vector<96x16xf32> to vector<1x16xf32>
    %28 = vector.extract_strided_slice %18 {offsets = [0, 0], sizes = [1, 16], strides = [1, 1]} : vector<96x16xf32> to vector<1x16xf32>
    %c7 = arith.constant 7 : index
    %c0_10 = arith.constant 0 : index
    %29 = vector.load %arg2[%c7, %c0_10] : memref<8x16xf32, #tpu.memory_space<vmem>>, vector<1x16xf32>
    %30 = arith.subf %27, %29 : vector<1x16xf32>
    %31 = math.absf %30 : vector<1x16xf32>
    %32 = arith.subf %27, %28 : vector<1x16xf32>
    %33 = math.absf %32 : vector<1x16xf32>
    %34 = arith.subf %31, %33 : vector<1x16xf32>
    %35 = vector.broadcast %26 : vector<1x1xf32> to vector<1x16xf32>
    %36 = arith.mulf %35, %34 : vector<1x16xf32>
    %37 = vector.shape_cast %36 : vector<1x16xf32> to vector<1x1x16xf32>
    %cst_11 = arith.constant dense<0.000000e+00> : vector<1xf32>
    %38 = vector.multi_reduction <add>, %37, %cst_11 [1, 2] : vector<1x1x16xf32> to vector<1xf32>
    %39 = vector.shape_cast %38 : vector<1xf32> to vector<1x1x1xf32>
    %40 = vector.extract %39[0, 0, 0] : f32 from vector<1x1x1xf32>
    %41 = arith.addf %25, %40 : f32
    %c0_12 = arith.constant 0 : index
    %c0_13 = arith.constant 0 : index
    %42 = memref.load %arg5[%c0_12, %c0_13] : memref<1x1xf32, #tpu.memory_space<smem>>
    memref.store %41, %arg5[%c0_12, %c0_13] : memref<1x1xf32, #tpu.memory_space<smem>>
    return
  }
  func.func @transform_0(%arg0: i32) -> (i32, i32) {
    %c0_i32 = arith.constant 0 : i32
    %c0_i32_0 = arith.constant 0 : i32
    return %arg0, %c0_i32 : i32, i32
  }
  func.func @transform_1(%arg0: i32) -> (i32, i32) {
    %c12_i32 = arith.constant 12 : i32
    %0 = arith.muli %arg0, %c12_i32 : i32
    %c1_i32 = arith.constant 1 : i32
    %1 = arith.subi %0, %c1_i32 : i32
    %c0_i32 = arith.constant 0 : i32
    %2 = arith.maxsi %1, %c0_i32 : i32
    %c0_i32_0 = arith.constant 0 : i32
    %c0_i32_1 = arith.constant 0 : i32
    return %2, %c0_i32_0 : i32, i32
  }
  func.func @transform_2(%arg0: i32) -> (i32, i32) {
    %c0_i32 = arith.constant 0 : i32
    %c0_i32_0 = arith.constant 0 : i32
    %c0_i32_1 = arith.constant 0 : i32
    return %c0_i32, %c0_i32_0 : i32, i32
  }
  func.func @transform_3(%arg0: i32) -> (i32, i32) {
    %c0_i32 = arith.constant 0 : i32
    %c0_i32_0 = arith.constant 0 : i32
    return %arg0, %c0_i32 : i32, i32
  }
  func.func @transform_4(%arg0: i32) -> (i32, i32) {
    %c0_i32 = arith.constant 0 : i32
    %c0_i32_0 = arith.constant 0 : i32
    return %arg0, %c0_i32 : i32, i32
  }
}

</mosaic_0001>

<bundles_post_ra>
// kernel: tpu_custom_call.1
= control target key start
LH: loop header
LB: loop body
LE: loop exit
PB: predicated region body
PF: predicated region fallthrough
CT: control target
= control target key end

     0   :  { %s484_s19 = smov 16   ;;  %s874_s0 = inlined_call_operand.vmem [shape: f32[96,16], index: 0, kind: input, shape index: {}]   ;;  %s875_s1 = inlined_call_operand.vmem [shape: f32[96,16], index: 1, kind: input, shape index: {}]   ;;  %s876_s2 = inlined_call_operand.vmem [shape: f32[1,16], index: 2, kind: input, shape index: {}]   ;;  %s877_s3 = inlined_call_operand.vmem [shape: f32[96,1], index: 3, kind: input, shape index: {}]   ;;  %s878_s4 = inlined_call_operand.hbm [shape: f32[1,1], index: 4, kind: output, shape index: {}]  }
   0x1   :  { %v516_v0 = vld [vmem:[%s874_s0] sm:$0xff]  ;;  %v521_v1 = vld [vmem:[%s874_s0 + $0x10] sm:$0xff]  ;;  %v530_v2 = vld [vmem:[%s874_s0 + $0x8] sm:$0xff] }
   0x2   :  { %76 = vrot.lane.b32.xlu0 %v516_v0, %s484_s19  ;;  %82 = vrot.lane.b32.xlu1 %v521_v1, %s484_s19  ;;  %v535_v3 = vld [vmem:[%s874_s0 + $0x18] sm:$0xff] }
   0x3   :  { %9 = vsyncpa [#allocation3], 0  ;;  %v544_v4 = vld [vmem:[%s874_s0 + $0x20] sm:$0xff]  ;;  %v549_v5 = vld [vmem:[%s874_s0 + $0x28] sm:$0xff]  ;;  %v485_v10 = vmov 0   ;;  %vm75_vm0 = vcmask 1047680  }
   0x4   :  { %v558_v6 = vld [vmem:[%s874_s0 + $0x38] sm:$0xff]  ;;  %v563_v7 = vld [vmem:[%s874_s0 + $0x30] sm:$0xff]  ;;  %v572_v8 = vld [vmem:[%s874_s0 + $0x48] sm:$0xff]  ;;  %470 = vset.pattern.permute.xlu0 %v485_v10  ;;  %471 = vset.pattern.permute.xlu1 %v485_v10  ;;  %s486_s11 = smov 113   ;;  %s472_s17 = scalar_lea.hbm %s878_s4, 16 }
   0x5   :  { %v577_v9 = vld [vmem:[%s874_s0 + $0x40] sm:$0xff]  ;;  %v588_v11 = vld [vmem:[%s874_s0 + $0x58] sm:$0xff]  ;;  %v593_v12 = vld [vmem:[%s874_s0 + $0x50] sm:$0xff]  ;;  %p473_p0 = scmp.ne.s32.totalorder %s878_s4, %s472_s17  ;;  %p476_p1 = scmp.lt.u32.totalorder %s472_s17, %s878_s4 }
   0x6   :  { %79 = vrot.lane.b32.xlu0 %v530_v2, %s484_s19  ;;  %85 = vrot.lane.b32.xlu1 %v535_v3, %s484_s19  ;;  %v627_v32 = vld [vmem:[%s877_s3] sm:$0xff]  ;;  %v66_v37 = vld [vmem:[%s877_s3 + $0x18] sm:$0xff] }
   0x7   :  { %vm266_vm1 = vcmp.ne.f32.partialorder %v627_v32, 0.0  ;;  %v64_v38 = vld [vmem:[%s877_s3 + $0x8] sm:$0xff]  ;;  %vm269_vm2 = vcmp.ne.f32.partialorder %v66_v37, 0.0  ;;  %v65_v42 = vld [vmem:[%s877_s3 + $0x10] sm:$0xff]  ;;  %v67_v46 = vld [vmem:[%s877_s3 + $0x20] sm:$0xff]  ;;  %p478_p2 = pnand %p476_p1, %p473_p0 }
   0x8   :  { %v278_v40 = vsel %vm266_vm1, 1, %v485_v10  ;;  %vm267_vm3 = vcmp.ne.f32.partialorder %v64_v38, 0.0  ;;  %v68_v41 = vld [vmem:[%s877_s3 + $0x28] sm:$0xff]  ;;  %v281_v43 = vsel %vm269_vm2, 1, %v485_v10  ;;  %vm268_vm5 = vcmp.ne.f32.partialorder %v65_v42, 0.0  ;;  %v69_v45 = vld [vmem:[%s877_s3 + $0x30] sm:$0xff] }
   0x9   :  { %v279_v44 = vsel %vm267_vm3, 1, %v485_v10  ;;  %vm271_vm4 = vcmp.ne.f32.partialorder %v68_v41, 0.0  ;;  %v280_v48 = vsel %vm268_vm5, 1, %v485_v10  ;;  %vm272_vm6 = vcmp.ne.f32.partialorder %v69_v45, 0.0  ;;  %v70_v49 = vld [vmem:[%s877_s3 + $0x38] sm:$0xff]  ;;  %v71_v52 = vld [vmem:[%s877_s3 + $0x40] sm:$0xff] }
   0xa   :  { %88 = vrot.lane.b32.xlu0 %v544_v4, %s484_s19  ;;  %91 = vrot.lane.b32.xlu1 %v549_v5, %s484_s19  ;;  %v283_v47 = vsel %vm271_vm4, 1, %v485_v10  ;;  %vm270_vm7 = vcmp.ne.f32.partialorder %v67_v46, 0.0  ;;  %v284_v50 = vsel %vm272_vm6, 1, %v485_v10  ;;  %vm273_vm8 = vcmp.ne.f32.partialorder %v70_v49, 0.0  ;;  %v72_v54 = vld [vmem:[%s877_s3 + $0x48] sm:$0xff]  ;;  %v73_v57 = vld [vmem:[%s877_s3 + $0x50] sm:$0xff] }
   0xb   :  { %v282_v51 = vsel %vm270_vm7, 1, %v485_v10  ;;  %v285_v53 = vsel %vm273_vm8, 1, %v485_v10  ;;  %vm274_vm9 = vcmp.ne.f32.partialorder %v71_v52, 0.0  ;;  %vm275_vm10 = vcmp.ne.f32.partialorder %v72_v54, 0.0  ;;  %v74_v60 = vld [vmem:[%s877_s3 + $0x58] sm:$0xff] }
   0xc   :  { %v286_v55 = vsel %vm274_vm9, 1, %v485_v10  ;;  %v287_v56 = vsel %vm275_vm10, 1, %v485_v10  ;;  %vm276_vm11 = vcmp.ne.f32.partialorder %v73_v57, 0.0  ;;  %vm277_vm12 = vcmp.ne.f32.partialorder %v74_v60, 0.0 }
   0xd   :  { %v288_v61 = vsel %vm276_vm11, 1, %v485_v10  ;;  %v150_v41 = vlaneseq  ;;  %v250_v49 = vrot.slane %v588_v11, 7  ;;  %v240_v52 = vrot.slane %v530_v2, 7 }
   0xe   :  { %97 = vrot.lane.b32.xlu1 %v558_v6, %s484_s19  ;;  %94 = vrot.lane.b32.xlu0 %v563_v7, %s484_s19  ;;  %v241_v54 = vrot.slane %v521_v1, 7  ;;  %v244_v57 = vrot.slane %v549_v5, 7  ;;  %v246_v60 = vrot.slane %v558_v6, 7  ;;  %vm386_vm7 = vcmask 130048  }
  0x12   :  { %103 = vrot.lane.b32.xlu1 %v572_v8, %s484_s19  ;;  %100 = vrot.lane.b32.xlu0 %v577_v9, %s484_s19 }
  0x16   :  { %109 = vrot.lane.b32.xlu1 %v588_v11, %s484_s19  ;;  %106 = vrot.lane.b32.xlu0 %v593_v12, %s484_s19 }
  0x74   :  { %v77_v13 = vpop.permute.xlu0 %76  ;;  %v83_v14 = vpop.permute.xlu1 %82 }
  0x75   :  { %v78_v15 = vsel %vm75_vm0, %v77_v13, %v516_v0  ;;  %v84_v16 = vsel %vm75_vm0, %v83_v14, %v521_v1  ;;  %v289_v14 = vsel %vm277_vm12, 1, %v485_v10 }
  0x76   :  { %112 = vrot.lane.b32.xlu0 %v78_v15, %s484_s19 }
  0x78   :  { %v80_v17 = vpop.permute.xlu0 %79  ;;  %v86_v18 = vpop.permute.xlu1 %85 }
  0x79   :  { %v81_v19 = vsel %vm75_vm0, %v80_v17, %v530_v2  ;;  %v87_v20 = vsel %vm75_vm0, %v86_v18, %v535_v3 }
  0x7a   :  { %114 = vrot.lane.b32.xlu1 %v81_v19, %s484_s19  ;;  %116 = vrot.lane.b32.xlu0 %v84_v16, %s484_s19 }
  0x7c   :  { %v89_v21 = vpop.permute.xlu0 %88  ;;  %v92_v22 = vpop.permute.xlu1 %91 }
  0x7d   :  { %v90_v23 = vsel %vm75_vm0, %v89_v21, %v544_v4  ;;  %v93_v24 = vsel %vm75_vm0, %v92_v22, %v549_v5 }
  0x7e   :  { %118 = vrot.lane.b32.xlu1 %v87_v20, %s484_s19  ;;  %120 = vrot.lane.b32.xlu0 %v90_v23, %s484_s19 }
  0x80   :  { %v98_v25 = vpop.permute.xlu1 %97  ;;  %v95_v26 = vpop.permute.xlu0 %94 }
  0x81   :  { %v96_v27 = vsel %vm75_vm0, %v95_v26, %v563_v7  ;;  %v99_v28 = vsel %vm75_vm0, %v98_v25, %v558_v6 }
  0x82   :  { %122 = vrot.lane.b32.xlu1 %v93_v24, %s484_s19  ;;  %124 = vrot.lane.b32.xlu0 %v96_v27, %s484_s19 }
  0x84   :  { %v104_v29 = vpop.permute.xlu1 %103  ;;  %v101_v30 = vpop.permute.xlu0 %100 }
  0x85   :  { %v102_v31 = vsel %vm75_vm0, %v101_v30, %v577_v9  ;;  %v105_v33 = vsel %vm75_vm0, %v104_v29, %v572_v8 }
  0x86   :  { %126 = vrot.lane.b32.xlu1 %v99_v28, %s484_s19  ;;  %128 = vrot.lane.b32.xlu0 %v102_v31, %s484_s19 }
  0x88   :  { %v110_v34 = vpop.permute.xlu1 %109  ;;  %v107_v35 = vpop.permute.xlu0 %106 }
  0x89   :  { %v108_v36 = vsel %vm75_vm0, %v107_v35, %v593_v12  ;;  %v111_v39 = vsel %vm75_vm0, %v110_v34, %v588_v11 }
  0x8a   :  { %130 = vrot.lane.b32.xlu1 %v105_v33, %s484_s19  ;;  %132 = vrot.lane.b32.xlu0 %v108_v36, %s484_s19 }
  0x8e   :  { %134 = vrot.lane.b32.xlu1 %v111_v39, %s484_s19  ;;  %291 = vperm.xlu0 %470, %v278_v40  }
  0x92   :  { %300 = vperm.xlu0 %470, %v281_v43   ;;  %294 = vperm.xlu1 %471, %v279_v44   ;;  %v62_v43 = vld [vmem:[%s876_s2] sm:$0x1]  ;;  %v732_v44 = vshrl.u32 %v150_v41, 7 }
  0x93   :  { %vm148_vm13 = vcmp.ne.f32.partialorder %v62_v43, 0.0 }
  0x94   :  { %v152_v46 = vsub.s32 0, %v732_v44  ;;  %vm253_vm14 = vcmp.lt.s32.totalorder %v732_v44, 1 }
  0x96   :  { %306 = vperm.xlu0 %470, %v283_v47   ;;  %297 = vperm.xlu1 %471, %v280_v48   ;;  %v149_v47 = vsel %vm148_vm13, 1, %v485_v10  ;;  %vm429_vm13 = vcmask 122880  }
  0x9a   :  { %309 = vperm.xlu0 %470, %v284_v50   ;;  %303 = vperm.xlu1 %471, %v282_v51   ;;  %v239_v50 = vrot.slane %v516_v0, 7  ;;  %v743_v51 = vrot.slane %v149_v47, %v152_v46 }
  0x9c   :  { %v265_v10 = vsel %vm253_vm14, %v250_v49, %v239_v50 }
  0x9e   :  { %312 = vperm.xlu0 %470, %v285_v53  }
  0xa2   :  { %315 = vperm.xlu0 %470, %v286_v55   ;;  %v242_v55 = vrot.slane %v535_v3, 7 }
  0xa6   :  { %318 = vperm.xlu0 %470, %v287_v56   ;;  %v243_v56 = vrot.slane %v544_v4, 7 }
  0xe8   :  { %v113_v58 = vpop.permute.xlu0 %112 }
  0xe9   :  { %v136_v59 = vsel %vm75_vm0, %v113_v58, %v516_v0  ;;  %v245_v58 = vrot.slane %v563_v7, 7 }
  0xea   :  { %167 = vrot.lane.b32.xlu0 %v136_v59, %s486_s11 }
  0xec   :  { %v115_v62 = vpop.permute.xlu1 %114  ;;  %v117_v63 = vpop.permute.xlu0 %116 }
  0xed   :  { %v137_v13 = vsel %vm75_vm0, %v115_v62, %v530_v2  ;;  %v138_v15 = vsel %vm75_vm0, %v117_v63, %v521_v1 }
  0xee   :  { %169 = vrot.lane.b32.xlu1 %v137_v13, %s486_s11  ;;  %321 = vperm.xlu0 %470, %v288_v61   ;;  %v264_v61 = vsel %vm253_vm14, %v239_v50, %v240_v52  ;;  %v263_v13 = vsel %vm253_vm14, %v240_v52, %v241_v54 }
  0xf0   :  { %v119_v16 = vpop.permute.xlu1 %118  ;;  %v121_v18 = vpop.permute.xlu0 %120 }
  0xf1   :  { %v139_v17 = vsel %vm75_vm0, %v119_v16, %v535_v3  ;;  %v140_v20 = vsel %vm75_vm0, %v121_v18, %v544_v4  ;;  %v260_v16 = vsel %vm253_vm14, %v243_v56, %v244_v57 }
  0xf2   :  { %324 = vperm.xlu0 %470, %v289_v14   ;;  %171 = vrot.lane.b32.xlu1 %v138_v15, %s486_s11  ;;  %v262_v15 = vsel %vm253_vm14, %v241_v54, %v242_v55 }
  0xf4   :  { %v123_v19 = vpop.permute.xlu1 %122  ;;  %v125_v23 = vpop.permute.xlu0 %124 }
  0xf5   :  { %v141_v22 = vsel %vm75_vm0, %v123_v19, %v549_v5  ;;  %v142_v26 = vsel %vm75_vm0, %v125_v23, %v563_v7  ;;  %v259_v19 = vsel %vm253_vm14, %v244_v57, %v245_v58  ;;  %v258_v23 = vsel %vm253_vm14, %v245_v58, %v246_v60 }
  0xf6   :  { %173 = vrot.lane.b32.xlu1 %v139_v17, %s486_s11  ;;  %v247_v17 = vrot.slane %v577_v9, 7 }
  0xf8   :  { %v127_v21 = vpop.permute.xlu1 %126  ;;  %v129_v29 = vpop.permute.xlu0 %128 }
  0xf9   :  { %v143_v30 = vsel %vm75_vm0, %v127_v21, %v558_v6  ;;  %v144_v31 = vsel %vm75_vm0, %v129_v29, %v577_v9 }
  0xfa   :  { %175 = vrot.lane.b32.xlu1 %v140_v20, %s486_s11 }
  0xfc   :  { %v131_v24 = vpop.permute.xlu1 %130  ;;  %v133_v33 = vpop.permute.xlu0 %132 }
  0xfd   :  { %v145_v25 = vsel %vm75_vm0, %v131_v24, %v572_v8  ;;  %v146_v34 = vsel %vm75_vm0, %v133_v33, %v593_v12  ;;  %v257_v33 = vsel %vm253_vm14, %v246_v60, %v247_v17 }
  0xfe   :  { %177 = vrot.lane.b32.xlu1 %v141_v22, %s486_s11  ;;  %185 = vrot.lane.b32.xlu0 %v145_v25, %s486_s11 }
 0x100   :  { %v135_v27 = vpop.permute.xlu1 %134 }
 0x101   :  { %v147_v28 = vsel %vm75_vm0, %v135_v27, %v588_v11  ;;  %vm154_vm0 = vcmp.eq.s32.totalorder %v743_v51, 1  ;;  %v261_v27 = vsel %vm253_vm14, %v242_v55, %v243_v56 }
 0x102   :  { %179 = vrot.lane.b32.xlu1 %v142_v26, %s486_s11  ;;  %189 = vrot.lane.b32.xlu0 %v147_v28, %s486_s11 }
 0x106   :  { %181 = vrot.lane.b32.xlu1 %v143_v30, %s486_s11 }
 0x10a   :  { %183 = vrot.lane.b32.xlu1 %v144_v31, %s486_s11 }
 0x10d   :  { %v292_v35 = vpop.permute.xlu0 %291 }
 0x10e   :  { %187 = vrot.lane.b32.xlu1 %v146_v34, %s486_s11  ;;  %vm326_vm15 = vcmp.eq.s32.totalorder %v292_v35, 1 }
 0x10f   :  { %v338_v63 = vsel %vm326_vm15, %v265_v10, 0.0 }
 0x110   :  { %v350_v22 = vsub.f32 %v516_v0, %v338_v63 }
 0x111   :  { %v301_v36 = vpop.permute.xlu0 %300  ;;  %v295_v39 = vpop.permute.xlu1 %294 }
 0x112   :  { %425 = vperm.xlu1 %471, %v627_v32   ;;  %vm327_vm1 = vcmp.eq.s32.totalorder %v295_v39, 1  ;;  %vm329_vm3 = vcmp.eq.s32.totalorder %v301_v36, 1  ;;  %v248_v36 = vrot.slane %v572_v8, 7  ;;  %v249_v39 = vrot.slane %v593_v12, 7 }
 0x113   :  { %v339_v20 = vsel %vm327_vm1, %v264_v61, 0.0  ;;  %v341_v30 = vsel %vm329_vm3, %v262_v15, 0.0  ;;  %v791_v41 = vand.u32 2147483647, %v350_v22 }
 0x114   :  { %v351_v31 = vsub.f32 %v530_v2, %v339_v20  ;;  %v353_v46 = vsub.f32 %v535_v3, %v341_v30  ;;  %v256_v10 = vsel %vm253_vm14, %v247_v17, %v248_v36  ;;  %v255_v61 = vsel %vm253_vm14, %v248_v36, %v249_v39 }
 0x115   :  { %v723_v37 = vpop.permute.xlu0 %306  ;;  %v298_v42 = vpop.permute.xlu1 %297 }
 0x116   :  { %vm328_vm2 = vcmp.eq.s32.totalorder %v298_v42, 1  ;;  %vm331_vm5 = vcmp.eq.s32.totalorder %v723_v37, 1  ;;  %v363_v52 = vand.u32 2147483647, %v351_v31 }
 0x117   :  { %v340_v24 = vsel %vm328_vm2, %v263_v13, 0.0  ;;  %v343_v50 = vsel %vm331_vm5, %v260_v16, 0.0  ;;  %v365_v13 = vand.u32 2147483647, %v353_v46 }
 0x118   :  { %v352_v35 = vsub.f32 %v521_v1, %v340_v24 }
 0x119   :  { %v725_v38 = vpop.permute.xlu0 %309  ;;  %v304_v32 = vpop.permute.xlu1 %303 }
 0x11a   :  { %vm330_vm4 = vcmp.eq.s32.totalorder %v304_v32, 1  ;;  %vm332_vm6 = vcmp.eq.s32.totalorder %v725_v38, 1  ;;  %v364_v55 = vand.u32 2147483647, %v352_v35 }
 0x11b   :  { %v342_v42 = vsel %vm330_vm4, %v261_v27, 0.0 }
 0x11c   :  { %v354_v56 = vsub.f32 %v544_v4, %v342_v42 }
 0x11d   :  { %v727_v40 = vpop.permute.xlu0 %312 }
 0x11e   :  { %vm333_vm8 = vcmp.eq.s32.totalorder %v727_v40, 1  ;;  %v366_v17 = vand.u32 2147483647, %v354_v56 }
 0x11f   :  { %v345_v16 = vsel %vm333_vm8, %v258_v23, 0.0 }
 0x121   :  { %v734_v45 = vpop.permute.xlu0 %315 }
 0x122   :  { %vm334_vm9 = vcmp.eq.s32.totalorder %v734_v45, 1 }
 0x125   :  { %v738_v48 = vpop.permute.xlu0 %318 }
 0x126   :  { %vm335_vm10 = vcmp.eq.s32.totalorder %v738_v48, 1  ;;  %v346_v48 = vsel %vm334_vm9, %v257_v33, 0.0 }
 0x127   :  { %v347_v31 = vsel %vm335_vm10, %v256_v10, 0.0 }
 0x15c   :  { %v168_v59 = vpop.permute.xlu0 %167 }
 0x15d   :  { %v203_v18 = vsel %vm154_vm0, %v168_v59, 0.0  ;;  %v355_v59 = vsub.f32 %v549_v5, %v343_v50 }
 0x15e   :  { %v215_v28 = vsub.f32 %v516_v0, %v203_v18  ;;  %v254_v18 = vsel %vm253_vm14, %v249_v39, %v250_v49 }
 0x15f   :  { %v367_v24 = vand.u32 2147483647, %v355_v59 }
 0x160   :  { %v170_v53 = vpop.permute.xlu1 %169  ;;  %v227_v47 = vand.u32 2147483647, %v215_v28 }
 0x161   :  { %v204_v14 = vsel %vm154_vm0, %v170_v53, 0.0 }
 0x162   :  { %v216_v25 = vsub.f32 %v530_v2, %v204_v14  ;;  %v374_v60 = vadd.f32 %v791_v41, %v227_v47  ;;  %v358_v47 = vsub.f32 %v577_v9, %v346_v48 }
 0x164   :  { %v172_v62 = vpop.permute.xlu1 %171  ;;  %v228_v43 = vand.u32 2147483647, %v216_v25 }
 0x165   :  { %v205_v21 = vsel %vm154_vm0, %v172_v62, 0.0 }
 0x166   :  { %v217_v34 = vsub.f32 %v521_v1, %v205_v21  ;;  %v375_v38 = vadd.f32 %v363_v52, %v228_v43 }
 0x168   :  { %v174_v26 = vpop.permute.xlu1 %173  ;;  %v229_v53 = vand.u32 2147483647, %v217_v34 }
 0x169   :  { %v206_v29 = vsel %vm154_vm0, %v174_v26, 0.0 }
 0x16a   :  { %v218_v32 = vsub.f32 %v535_v3, %v206_v29  ;;  %v344_v3 = vsel %vm332_vm6, %v259_v19, 0.0  ;;  %v388_v19 = vsel %vm386_vm7, %v375_v38, 0.0  ;;  %v357_v29 = vsub.f32 %v558_v6, %v345_v16 }
 0x16b   :  { %v356_v40 = vsub.f32 %v563_v7, %v344_v3 }
 0x16c   :  { %v176_v2 = vpop.permute.xlu1 %175  ;;  %v230_v57 = vand.u32 2147483647, %v218_v32  ;;  %v369_v46 = vand.u32 2147483647, %v357_v29 }
 0x16d   :  { %v207_v37 = vsel %vm154_vm0, %v176_v2, 0.0  ;;  %v798_v1 = vpop.permute.xlu0 %321  ;;  %v368_v28 = vand.u32 2147483647, %v356_v40 }
 0x16e   :  { %v219_v54 = vsub.f32 %v544_v4, %v207_v37  ;;  %v376_v4 = vadd.f32 %v364_v55, %v229_v53  ;;  %v377_v20 = vadd.f32 %v365_v13, %v230_v57  ;;  %vm336_vm11 = vcmp.eq.s32.totalorder %v798_v1, 1 }
 0x16f   :  { %v359_v1 = vsub.f32 %v572_v8, %v347_v31  ;;  %v348_v52 = vsel %vm336_vm11, %v255_v61, 0.0 }
 0x170   :  { %v178_v58 = vpop.permute.xlu1 %177  ;;  %v231_v14 = vand.u32 2147483647, %v219_v54  ;;  %v390_v26 = vsel %vm386_vm7, %v376_v4, 0.0  ;;  %v392_v34 = vsel %vm386_vm7, %v377_v20, 0.0 }
 0x171   :  { %v208_v62 = vsel %vm154_vm0, %v178_v58, 0.0  ;;  %v325_v63 = vpop.permute.xlu0 %324 }
 0x172   :  { %v220_v15 = vsub.f32 %v549_v5, %v208_v62  ;;  %v387_v5 = vsel %vm386_vm7, %v374_v60, 0.0  ;;  %v378_v44 = vadd.f32 %v366_v17, %v231_v14  ;;  %vm337_vm12 = vcmp.eq.s32.totalorder %v325_v63, 1 }
 0x173   :  { %v389_v30 = vadd.f32 %v388_v19, %v387_v5  ;;  %v349_v56 = vsel %vm337_vm12, %v254_v18, 0.0  ;;  %v370_v60 = vand.u32 2147483647, %v358_v47  ;;  %v371_v62 = vand.u32 2147483647, %v359_v1 }
 0x174   :  { %v232_v21 = vand.u32 2147483647, %v220_v15  ;;  %v180_v22 = vpop.permute.xlu1 %179  ;;  %v394_v2 = vsel %vm386_vm7, %v378_v44, 0.0  ;;  %v361_v63 = vsub.f32 %v588_v11, %v349_v56  ;;  %v419_v5 = vld [vmem:[%s875_s1 + $0x7] sm:$0x1] }
 0x175   :  { %v209_v23 = vsel %vm154_vm0, %v180_v22, 0.0  ;;  %v186_v25 = vpop.permute.xlu0 %185  ;;  %v391_v42 = vadd.f32 %v390_v26, %v389_v30 }
 0x176   :  { %v221_v49 = vsub.f32 %v563_v7, %v209_v23  ;;  %v212_v27 = vsel %vm154_vm0, %v186_v25, 0.0  ;;  %v379_v35 = vadd.f32 %v367_v24, %v232_v21  ;;  %v373_v21 = vand.u32 2147483647, %v361_v63 }
 0x177   :  { %v224_v7 = vsub.f32 %v572_v8, %v212_v27  ;;  %v393_v37 = vadd.f32 %v392_v34, %v391_v42  ;;  %v360_v8 = vsub.f32 %v593_v12, %v348_v52 }
 0x178   :  { %v233_v36 = vand.u32 2147483647, %v221_v49  ;;  %v182_v39 = vpop.permute.xlu1 %181  ;;  %v396_v53 = vsel %vm386_vm7, %v379_v35, 0.0 }
 0x179   :  { %v210_v43 = vsel %vm154_vm0, %v182_v39, 0.0  ;;  %v190_v32 = vpop.permute.xlu0 %189  ;;  %v395_v10 = vadd.f32 %v394_v2, %v393_v37  ;;  %v236_v3 = vand.u32 2147483647, %v224_v7  ;;  %v372_v19 = vand.u32 2147483647, %v360_v8 }
 0x17a   :  { %v380_v45 = vadd.f32 %v368_v28, %v233_v36  ;;  %v222_v33 = vsub.f32 %v558_v6, %v210_v43  ;;  %v214_v50 = vsel %vm154_vm0, %v190_v32, 0.0 }
 0x17b   :  { %v226_v58 = vsub.f32 %v588_v11, %v214_v50  ;;  %v397_v61 = vadd.f32 %v396_v53, %v395_v10  ;;  %v383_v16 = vadd.f32 %v371_v62, %v236_v3 }
 0x17c   :  { %v234_v54 = vand.u32 2147483647, %v222_v33  ;;  %v184_v55 = vpop.permute.xlu1 %183  ;;  %v398_v38 = vsel %vm386_vm7, %v380_v45, 0.0 }
 0x17d   :  { %v211_v6 = vsel %vm154_vm0, %v184_v55, 0.0  ;;  %v399_v15 = vadd.f32 %v398_v38, %v397_v61  ;;  %v238_v17 = vand.u32 2147483647, %v226_v58  ;;  %v404_v23 = vsel %vm386_vm7, %v383_v16, 0.0 }
 0x17e   :  { %v381_v57 = vadd.f32 %v369_v46, %v234_v54  ;;  %v223_v59 = vsub.f32 %v577_v9, %v211_v6 }
 0x17f   :  { %v385_v51 = vadd.f32 %v373_v21, %v238_v17 }
 0x180   :  { %v400_v13 = vsel %vm386_vm7, %v381_v57, 0.0  ;;  %v235_v4 = vand.u32 2147483647, %v223_v59  ;;  %v188_v14 = vpop.permute.xlu1 %187 }
 0x181   :  { %v213_v40 = vsel %vm154_vm0, %v188_v14, 0.0  ;;  %v401_v20 = vadd.f32 %v400_v13, %v399_v15  ;;  %v408_v27 = vsel %vm386_vm7, %v385_v51, 0.0 }
 0x182   :  { %v382_v18 = vadd.f32 %v370_v60, %v235_v4  ;;  %v225_v9 = vsub.f32 %v593_v12, %v213_v40  ;;  %v420_v12 = vsub.f32 %v516_v0, %v419_v5 }
 0x184   :  { %v402_v22 = vsel %vm386_vm7, %v382_v18, 0.0  ;;  %v237_v24 = vand.u32 2147483647, %v225_v9  ;;  %v421_v29 = vand.u32 2147483647, %v420_v12 }
 0x185   :  { %v403_v11 = vadd.f32 %v402_v22, %v401_v20 }
 0x186   :  { %v384_v25 = vadd.f32 %v372_v19, %v237_v24  ;;  %v422_v48 = vsub.f32 %v421_v29, %v791_v41 }
 0x187   :  { %v405_v26 = vadd.f32 %v404_v23, %v403_v11 }
 0x188   :  { %v406_v44 = vsel %vm386_vm7, %v384_v25, 0.0 }
 0x189   :  { %v407_v49 = vadd.f32 %v406_v44, %v405_v26 }
 0x18b   :  { %v409_v28 = vadd.f32 %v408_v27, %v407_v49 }
 0x18d   :  { %410 = vadd.xlane.f32.xlu0 %v409_v28 }
 0x191   :  { %v426_v30 = vpop.permute.xlu1 %425 }
 0x192   :  { %v428_v31 = vmul.f32 %v426_v30, %v422_v48 }
 0x194   :  { %v430_v34 = vsel %vm429_vm13, %v428_v31, 0.0 }
 0x195   :  { %431 = vadd.xlane.f32.xlu1 %v430_v34 }
 0x21a   :  { %v411_v35 = vpop.xlane.xlu0 %410 }
 0x21b   :  { %v412_v36 = vrot.slane %v411_v35, 4 }
 0x21d   :  { %v413_v39 = vadd.f32 %v412_v36, %v411_v35 }
 0x21f   :  { %v414_v42 = vrot.slane %v413_v39, 2 }
 0x221   :  { %v415_v7 = vadd.f32 %v414_v42, %v413_v39 }
 0x222   :  { %v432_v43 = vpop.xlane.xlu1 %431 }
 0x223   :  { %v433_v0 = vrot.slane %v432_v43, 4  ;;  %v416_v32 = vrot.slane %v415_v7, 1 }
 0x225   :  { %v434_v2 = vadd.f32 %v433_v0, %v432_v43  ;;  %v417_v45 = vadd.f32 %v416_v32, %v415_v7 }
 0x227   :  { %v435_v33 = vrot.slane %v434_v2, 2  ;;  %462 = vpush %v417_v45 }
 0x229   :  { %v436_v46 = vadd.f32 %v435_v33, %v434_v2 }
 0x22b   :  { %v437_v47 = vrot.slane %v436_v46, 1 }
 0x22d   :  { %v438_v41 = vadd.f32 %v437_v47, %v436_v46 }
 0x22f   :  { %464 = vpush %v438_v41 }
 0x258   :  { %s463_s1 = spop %462 }
 0x260   :  { %s465_s0 = spop %464 }
 0x261   :  { %s440_s14 = sadd.f32 %s465_s0, %s463_s1 }
 0x263   :  { %442 = sst [smem:[#allocation2]] %s440_s14 }
 0x264   :  { %481 = shalt.err (!%p478_p2)
}
 0x265   :  { %s487_s23 = smov [#allocation2]  }
 0x266   :  { %450 = dma.smem_to_hbm %s487_s23, 16, %s878_s4, [#allocation3]  }
 0x267   :  { %482 = dma.done.wait [#allocation3], 16  }
 0x268   :  { %483 = vsyncadd [#allocation3], 4294967280 }
 0x269   :  { %454 = sfence }
 0x26a   :  { %455 = vsyncpa [#allocation3], 1 }

</bundles_post_ra>
